<compile_context>
chip_gen: v7x
topology: tpu7x:2x2x1
jax: 0.10.0
libtpu: 0.0.40
codegen_flags: <defaults>
</compile_context>

<pallas_src>
import jax
import jax.numpy as jnp
from jax import lax
from jax.experimental import pallas as pl
from jax.experimental.pallas import tpu as pltpu

EPS = 1e-5


def double_layer_kernel(x_ref, w1_ref, w2_ref, p_ref, o_ref):
    # x_ref: [B, in_dim] block for ONE group; BN stats are per-group by construction.
    # p_ref rows: 0=gamma1, 1=beta1, 2=gamma2, 3=beta2   (each [1, out_dim], f32)
    x = x_ref[...]
    inv_b = 1.0 / x.shape[0]  # static

    g1, be1 = p_ref[0:1, :], p_ref[1:2, :]
    g2, be2 = p_ref[2:3, :], p_ref[3:4, :]

    # ----- layer 1: Linear (bias cancelled by train-mode BN) + BatchNorm1d + ReLU -----
    h1 = jnp.dot(x, w1_ref[...], preferred_element_type=jnp.float32)
    s1 = jnp.sum(h1, axis=0, keepdims=True)
    ss1 = jnp.sum(h1 * h1, axis=0, keepdims=True)
    m1 = s1 * inv_b
    v1 = jnp.maximum(ss1 * inv_b - m1 * m1, 0.0)   # clamp: cancellation can go < 0
    scale1 = g1 * lax.rsqrt(v1 + EPS)              # EUP rsqrt (free slot)
    shift1 = be1 - m1 * scale1
    out1 = jnp.maximum(h1 * scale1 + shift1, 0.0)

    # ----- layer 2: Linear + BatchNorm1d + ReLU -----
    h2 = jnp.dot(out1, w2_ref[...], preferred_element_type=jnp.float32)
    s2 = jnp.sum(h2, axis=0, keepdims=True)
    ss2 = jnp.sum(h2 * h2, axis=0, keepdims=True)
    m2 = s2 * inv_b
    v2 = jnp.maximum(ss2 * inv_b - m2 * m2, 0.0)
    scale2 = g2 * lax.rsqrt(v2 + EPS)
    shift2 = be2 - m2 * scale2
    out2 = jnp.maximum(h2 * scale2 + shift2, 0.0)

    # ----- residual -----
    o_ref[...] = (out2 + out1).astype(o_ref.dtype)


def pack_bn_params(gamma1, beta1, gamma2, beta2):
    """Pack the 4 per-feature BN vectors into one [4, out_dim] f32 tile.
    Call ONCE at parameter-setup time (not in the per-step hot path)."""
    return jnp.concatenate([gamma1, beta1, gamma2, beta2], axis=0).astype(jnp.float32)


def double_layer(x, w1, w2, bn_params):
    """Forward of DoubleLayer (batch_norm=True, resnet=True, training mode).

    x         : [B, in_dim] (single group)  or  [N, B, in_dim] (N independent groups,
                BN statistics computed per group -> equivalent to N module calls).
    w1        : [in_dim, out_dim]   (pre-transposed, f32)
    w2        : [out_dim, out_dim]  (pre-transposed, f32)
    bn_params : [4, out_dim] from pack_bn_params (gamma1, beta1, gamma2, beta2)

    Linear biases are intentionally absent: they cancel exactly under train-mode BN.
    """
    if x.ndim == 2:
        n_groups, b = 1, x.shape[0]
    else:
        n_groups, b = x.shape[0], x.shape[1]
    in_dim = x.shape[-1]
    out_dim = w1.shape[1]

    x2d = x.reshape(n_groups * b, in_dim)  # metadata-only reshape

    out = pl.pallas_call(
        double_layer_kernel,
        out_shape=jax.ShapeDtypeStruct((n_groups * b, out_dim), jnp.float32),
        grid=(n_groups,),
        in_specs=[
            pl.BlockSpec((b, in_dim), lambda g: (g, 0)),            # per-group x block
            pl.BlockSpec((in_dim, out_dim), lambda g: (0, 0)),      # w1 resident
            pl.BlockSpec((out_dim, out_dim), lambda g: (0, 0)),     # w2 resident
            pl.BlockSpec((4, out_dim), lambda g: (0, 0)),           # packed BN params
        ],
        out_specs=pl.BlockSpec((b, out_dim), lambda g: (g, 0)),
        # Group axis is fully independent -> shard across TensorCores on v7x.
        compiler_params=pltpu.CompilerParams(dimension_semantics=("parallel",)),
    )(x2d, w1, w2, bn_params)

    return out.reshape(x.shape[:-1] + (out_dim,))


def reference(x, w1, b1, g1, be1, w2, b2, g2, be2):
    """Pure-JAX reference including the Linear biases (kernel drops them; math is exact)."""
    h1 = x @ w1 + b1
    m1 = h1.mean(0, keepdims=True)
    v1 = ((h1 - m1) ** 2).mean(0, keepdims=True)
    out1 = jnp.maximum(g1 * (h1 - m1) / jnp.sqrt(v1 + EPS) + be1, 0.0)
    h2 = out1 @ w2 + b2
    m2 = h2.mean(0, keepdims=True)
    v2 = ((h2 - m2) ** 2).mean(0, keepdims=True)
    out2 = jnp.maximum(g2 * (h2 - m2) / jnp.sqrt(v2 + EPS) + be2, 0.0)
    return out2 + out1


if __name__ == "__main__":
    B, in_dim, out_dim = 8, 32, 128
    N_GROUPS = 4

    key = jax.random.PRNGKey(0)
    (kx, kxg, kw1, kb1, kw2, kb2, kg1, kbe1, kg2, kbe2) = jax.random.split(key, 10)

    x = jax.random.normal(kx, (B, in_dim), dtype=jnp.float32)
    x_groups = jax.random.normal(kxg, (N_GROUPS, B, in_dim), dtype=jnp.float32)

    # PyTorch-style uniform(-1/sqrt(fan_in), 1/sqrt(fan_in)) init, deterministic.
    lim1 = 1.0 / jnp.sqrt(in_dim)
    lim2 = 1.0 / jnp.sqrt(out_dim)
    w1 = jax.random.uniform(kw1, (in_dim, out_dim), jnp.float32, -lim1, lim1)
    b1 = jax.random.uniform(kb1, (1, out_dim), jnp.float32, -lim1, lim1)
    w2 = jax.random.uniform(kw2, (out_dim, out_dim), jnp.float32, -lim2, lim2)
    b2 = jax.random.uniform(kb2, (1, out_dim), jnp.float32, -lim2, lim2)

    # Non-trivial BN affine params (as in a trained module) to exercise the fold.
    g1 = jax.random.uniform(kg1, (1, out_dim), jnp.float32, 0.5, 1.5)
    be1 = jax.random.uniform(kbe1, (1, out_dim), jnp.float32, -0.5, 0.5)
    g2 = jax.random.uniform(kg2, (1, out_dim), jnp.float32, 0.5, 1.5)
    be2 = jax.random.uniform(kbe2, (1, out_dim), jnp.float32, -0.5, 0.5)

    # Setup-time packing (kept out of the per-call hot path).
    bn_params = jax.block_until_ready(pack_bn_params(g1, be1, g2, be2))

    # ---- single-group path (matches one PyTorch forward call) ----
    ref = reference(x, w1, b1, g1, be1, w2, b2, g2, be2)
    out = jax.block_until_ready(double_layer(x, w1, w2, bn_params))
    assert out.shape == (B, out_dim)
    assert jnp.allclose(out, ref, atol=1e-4, rtol=1e-4), "single-group mismatch vs reference"

    # ---- grouped path: N independent module calls fused into one launch ----
    ref_g = jax.vmap(
        lambda xg: reference(xg, w1, b1, g1, be1, w2, b2, g2, be2)
    )(x_groups)
    out_g = jax.block_until_ready(double_layer(x_groups, w1, w2, bn_params))
    assert out_g.shape == (N_GROUPS, B, out_dim)
    assert jnp.allclose(out_g, ref_g, atol=1e-4, rtol=1e-4), "grouped mismatch vs reference"

    print("KERNEL_OK")
</pallas_src>

<mosaic_0001>
module attributes {stable_mosaic.version = 11 : i64} {
  func.func @double_layer_kernel(%arg0: i32, %arg1: memref<8x32xf32, #tpu.memory_space<vmem>>, %arg2: memref<32x128xf32, #tpu.memory_space<vmem>>, %arg3: memref<128x128xf32, #tpu.memory_space<vmem>>, %arg4: memref<4x128xf32, #tpu.memory_space<vmem>>, %arg5: memref<8x128xf32, #tpu.memory_space<vmem>>) attributes {dimension_semantics = [#tpu.dimension_semantics<parallel>], iteration_bounds = array<i64: 1>, scalar_prefetch = 0 : i64, scratch_operands = 0 : i64, tpu.core_type = #tpu.core_type<tc>, window_params = [{transform_indices = @transform_0, window_bounds = array<i64: 8, 32>}, {pipeline_mode = #tpu.pipeline_mode<synchronous>, transform_indices = @transform_1, window_bounds = array<i64: 32, 128>}, {pipeline_mode = #tpu.pipeline_mode<synchronous>, transform_indices = @transform_2, window_bounds = array<i64: 128, 128>}, {pipeline_mode = #tpu.pipeline_mode<synchronous>, transform_indices = @transform_3, window_bounds = array<i64: 4, 128>}, {transform_indices = @transform_4, window_bounds = array<i64: 8, 128>}]} {
    %c0 = arith.constant 0 : index
    %c0_0 = arith.constant 0 : index
    %0 = vector.load %arg1[%c0, %c0_0] : memref<8x32xf32, #tpu.memory_space<vmem>>, vector<8x32xf32>
    %c0_1 = arith.constant 0 : index
    %c0_2 = arith.constant 0 : index
    %1 = vector.load %arg4[%c0_1, %c0_2] : memref<4x128xf32, #tpu.memory_space<vmem>>, vector<1x128xf32>
    %c1 = arith.constant 1 : index
    %c0_3 = arith.constant 0 : index
    %2 = vector.load %arg4[%c1, %c0_3] : memref<4x128xf32, #tpu.memory_space<vmem>>, vector<1x128xf32>
    %c2 = arith.constant 2 : index
    %c0_4 = arith.constant 0 : index
    %3 = vector.load %arg4[%c2, %c0_4] : memref<4x128xf32, #tpu.memory_space<vmem>>, vector<1x128xf32>
    %c3 = arith.constant 3 : index
    %c0_5 = arith.constant 0 : index
    %4 = vector.load %arg4[%c3, %c0_5] : memref<4x128xf32, #tpu.memory_space<vmem>>, vector<1x128xf32>
    %c0_6 = arith.constant 0 : index
    %c0_7 = arith.constant 0 : index
    %5 = vector.load %arg2[%c0_6, %c0_7] : memref<32x128xf32, #tpu.memory_space<vmem>>, vector<32x128xf32>
    %cst = arith.constant dense<0.000000e+00> : vector<8x128xf32>
    %6 = tpu.matmul %0, %5, %cst {dimension_numbers = #tpu.dot_dimension_numbers<[1], [0], [0], [1], [0, 0, 1, 1], [], []>} : vector<8x32xf32>, vector<32x128xf32>, vector<8x128xf32> -> vector<8x128xf32>
    %cst_8 = arith.constant dense<0.000000e+00> : vector<128xf32>
    %7 = vector.multi_reduction <add>, %6, %cst_8 [0] : vector<8x128xf32> to vector<128xf32>
    %8 = vector.shape_cast %7 : vector<128xf32> to vector<1x128xf32>
    %9 = arith.mulf %6, %6 : vector<8x128xf32>
    %cst_9 = arith.constant dense<0.000000e+00> : vector<128xf32>
    %10 = vector.multi_reduction <add>, %9, %cst_9 [0] : vector<8x128xf32> to vector<128xf32>
    %11 = vector.shape_cast %10 : vector<128xf32> to vector<1x128xf32>
    %cst_10 = arith.constant 1.250000e-01 : f32
    %12 = vector.broadcast %cst_10 : f32 to vector<1x128xf32>
    %13 = arith.mulf %8, %12 : vector<1x128xf32>
    %cst_11 = arith.constant 1.250000e-01 : f32
    %14 = vector.broadcast %cst_11 : f32 to vector<1x128xf32>
    %15 = arith.mulf %11, %14 : vector<1x128xf32>
    %16 = arith.mulf %13, %13 : vector<1x128xf32>
    %17 = arith.subf %15, %16 : vector<1x128xf32>
    %cst_12 = arith.constant 0.000000e+00 : f32
    %18 = vector.broadcast %cst_12 : f32 to vector<1x128xf32>
    %19 = arith.maximumf %17, %18 : vector<1x128xf32>
    %cst_13 = arith.constant 9.99999974E-6 : f32
    %20 = vector.broadcast %cst_13 : f32 to vector<1x128xf32>
    %21 = arith.addf %19, %20 : vector<1x128xf32>
    %22 = math.rsqrt %21 : vector<1x128xf32>
    %23 = arith.mulf %1, %22 : vector<1x128xf32>
    %24 = arith.mulf %13, %23 : vector<1x128xf32>
    %25 = arith.subf %2, %24 : vector<1x128xf32>
    %26 = vector.broadcast %23 : vector<1x128xf32> to vector<8x128xf32>
    %27 = arith.mulf %6, %26 : vector<8x128xf32>
    %28 = vector.broadcast %25 : vector<1x128xf32> to vector<8x128xf32>
    %29 = arith.addf %27, %28 : vector<8x128xf32>
    %cst_14 = arith.constant 0.000000e+00 : f32
    %30 = vector.broadcast %cst_14 : f32 to vector<8x128xf32>
    %31 = arith.maximumf %29, %30 : vector<8x128xf32>
    %c0_15 = arith.constant 0 : index
    %c0_16 = arith.constant 0 : index
    %32 = vector.load %arg3[%c0_15, %c0_16] : memref<128x128xf32, #tpu.memory_space<vmem>>, vector<128x128xf32>
    %cst_17 = arith.constant dense<0.000000e+00> : vector<8x128xf32>
    %33 = tpu.matmul %31, %32, %cst_17 {dimension_numbers = #tpu.dot_dimension_numbers<[1], [0], [0], [1], [0, 0, 1, 1], [], []>} : vector<8x128xf32>, vector<128x128xf32>, vector<8x128xf32> -> vector<8x128xf32>
    %cst_18 = arith.constant dense<0.000000e+00> : vector<128xf32>
    %34 = vector.multi_reduction <add>, %33, %cst_18 [0] : vector<8x128xf32> to vector<128xf32>
    %35 = vector.shape_cast %34 : vector<128xf32> to vector<1x128xf32>
    %36 = arith.mulf %33, %33 : vector<8x128xf32>
    %cst_19 = arith.constant dense<0.000000e+00> : vector<128xf32>
    %37 = vector.multi_reduction <add>, %36, %cst_19 [0] : vector<8x128xf32> to vector<128xf32>
    %38 = vector.shape_cast %37 : vector<128xf32> to vector<1x128xf32>
    %cst_20 = arith.constant 1.250000e-01 : f32
    %39 = vector.broadcast %cst_20 : f32 to vector<1x128xf32>
    %40 = arith.mulf %35, %39 : vector<1x128xf32>
    %cst_21 = arith.constant 1.250000e-01 : f32
    %41 = vector.broadcast %cst_21 : f32 to vector<1x128xf32>
    %42 = arith.mulf %38, %41 : vector<1x128xf32>
    %43 = arith.mulf %40, %40 : vector<1x128xf32>
    %44 = arith.subf %42, %43 : vector<1x128xf32>
    %cst_22 = arith.constant 0.000000e+00 : f32
    %45 = vector.broadcast %cst_22 : f32 to vector<1x128xf32>
    %46 = arith.maximumf %44, %45 : vector<1x128xf32>
    %cst_23 = arith.constant 9.99999974E-6 : f32
    %47 = vector.broadcast %cst_23 : f32 to vector<1x128xf32>
    %48 = arith.addf %46, %47 : vector<1x128xf32>
    %49 = math.rsqrt %48 : vector<1x128xf32>
    %50 = arith.mulf %3, %49 : vector<1x128xf32>
    %51 = arith.mulf %40, %50 : vector<1x128xf32>
    %52 = arith.subf %4, %51 : vector<1x128xf32>
    %53 = vector.broadcast %50 : vector<1x128xf32> to vector<8x128xf32>
    %54 = arith.mulf %33, %53 : vector<8x128xf32>
    %55 = vector.broadcast %52 : vector<1x128xf32> to vector<8x128xf32>
    %56 = arith.addf %54, %55 : vector<8x128xf32>
    %cst_24 = arith.constant 0.000000e+00 : f32
    %57 = vector.broadcast %cst_24 : f32 to vector<8x128xf32>
    %58 = arith.maximumf %56, %57 : vector<8x128xf32>
    %59 = arith.addf %58, %31 : vector<8x128xf32>
    %c0_25 = arith.constant 0 : index
    %c0_26 = arith.constant 0 : index
    %60 = vector.load %arg5[%c0_25, %c0_26] : memref<8x128xf32, #tpu.memory_space<vmem>>, vector<8x128xf32>
    tpu.vector_store %arg5[%c0_25, %c0_26], %59 {strides = array<i32>} : memref<8x128xf32, #tpu.memory_space<vmem>>, vector<8x128xf32>,
    return
  }
  func.func @transform_0(%arg0: i32) -> (i32, i32) {
    %c0_i32 = arith.constant 0 : i32
    %c0_i32_0 = arith.constant 0 : i32
    return %arg0, %c0_i32 : i32, i32
  }
  func.func @transform_1(%arg0: i32) -> (i32, i32) {
    %c0_i32 = arith.constant 0 : i32
    %c0_i32_0 = arith.constant 0 : i32
    %c0_i32_1 = arith.constant 0 : i32
    return %c0_i32, %c0_i32_0 : i32, i32
  }
  func.func @transform_2(%arg0: i32) -> (i32, i32) {
    %c0_i32 = arith.constant 0 : i32
    %c0_i32_0 = arith.constant 0 : i32
    %c0_i32_1 = arith.constant 0 : i32
    return %c0_i32, %c0_i32_0 : i32, i32
  }
  func.func @transform_3(%arg0: i32) -> (i32, i32) {
    %c0_i32 = arith.constant 0 : i32
    %c0_i32_0 = arith.constant 0 : i32
    %c0_i32_1 = arith.constant 0 : i32
    return %c0_i32, %c0_i32_0 : i32, i32
  }
  func.func @transform_4(%arg0: i32) -> (i32, i32) {
    %c0_i32 = arith.constant 0 : i32
    %c0_i32_0 = arith.constant 0 : i32
    return %arg0, %c0_i32 : i32, i32
  }
}

</mosaic_0001>

<bundles_post_ra>
// kernel: tpu_custom_call.1
= control target key start
LH: loop header
LB: loop body
LE: loop exit
PB: predicated region body
PF: predicated region fallthrough
CT: control target
= control target key end

     0   :  { %9 = vsyncpa [#allocation3], 0  ;;  %s618_s0 = inlined_call_operand.hbm [shape: f32[8,32], index: 0, kind: input, shape index: {}]   ;;  %s619_s1 = inlined_call_operand.hbm [shape: f32[32,128], index: 1, kind: input, shape index: {}]   ;;  %s620_s2 = inlined_call_operand.hbm [shape: f32[128,128], index: 2, kind: input, shape index: {}]   ;;  %s621_s3 = inlined_call_operand.vmem [shape: f32[4,128], index: 3, kind: input, shape index: {}]   ;;  %s622_s4 = inlined_call_operand.hbm [shape: f32[8,128], index: 4, kind: output, shape index: {}]  }
   0x1   :  { %10 = vsyncpa [#allocation6], 0 }
   0x2   :  { %11 = vsyncpa [#allocation4], 0  ;;  %s518_s15 = smov [#allocation5]   ;;  %s424_s19 = scalar_lea.hbm %s619_s1, 512 }
   0x3   :  { %s27_s16 = sshll.u32 %s518_s15, 4  ;;  %p425_p0 = scmp.ne.s32.totalorder %s619_s1, %s424_s19  ;;  %s28_s16 = int_to_ptr.vmem [resolvable:$true] %s27_s16 }
   0x4   :  { %p428_p1 = scmp.lt.u32.totalorder %s424_s19, %s619_s1 }
   0x6   :  { %p430_p2 = pnand %p428_p1, %p425_p0 }
   0x8   :  { %433 = shalt.err (!%p430_p2)
}
   0x9   :  { %s434_s24 = scalar_lea.vmem %s28_s16, 512  ;;  %p439_p4 = scmp.lt.s32.totalorder %s28_s16, %s28_s16 }
   0xa   :  { %p435_p3 = scmp.ne.s32.totalorder %s28_s16, %s434_s24  ;;  %p440_p5 = scmp.lt.s32.totalorder %s434_s24, %s434_s24 }
   0xc   :  { %p441_p6 = por %p440_p5, %p439_p4 }
   0xe   :  { %p442_p7 = pnand %p441_p6, %p435_p3 }
  0x10   :  { %445 = shalt.err (!%p442_p7)
}
  0x11   :  { %s519_s25 = smov 128   ;;  %s520_s26 = smov 8  }
  0x12   :  { %33 = dma.hbm_to_vmem [thread:$0]  %s619_s1, 512, %s28_s16, [#allocation6], %s519_s25, %s519_s25, %s520_s26  }
  0x13   :  { %s521_s29 = smov [#allocation2]   ;;  %s522_s5 = smov [#allocation7]  }
  0x14   :  { %s18_s30 = sshll.u32 %s521_s29, 4  ;;  %s39_s6 = sshll.u32 %s522_s5, 4  ;;  %s19_s30 = int_to_ptr.vmem [resolvable:$true] %s18_s30  ;;  %s40_s6 = int_to_ptr.vmem [resolvable:$true] %s39_s6 }
  0x15   :  { %s446_s9 = scalar_lea.hbm %s618_s0, 128 }
  0x16   :  { %p447_p8 = scmp.ne.s32.totalorder %s618_s0, %s446_s9  ;;  %p450_p9 = scmp.lt.u32.totalorder %s446_s9, %s618_s0 }
  0x18   :  { %p452_p10 = pnand %p450_p9, %p447_p8 }
  0x1a   :  { %455 = shalt.err (!%p452_p10)
}
  0x1b   :  { %s456_s1 = scalar_lea.vmem %s19_s30, 128  ;;  %p461_p12 = scmp.lt.s32.totalorder %s19_s30, %s19_s30 }
  0x1c   :  { %p457_p11 = scmp.ne.s32.totalorder %s19_s30, %s456_s1  ;;  %p462_p13 = scmp.lt.s32.totalorder %s456_s1, %s456_s1 }
  0x1e   :  { %p463_p0 = por %p462_p13, %p461_p12 }
  0x20   :  { %p464_p1 = pnand %p463_p0, %p457_p11 }
  0x22   :  { %467 = shalt.err (!%p464_p1)
}
  0x23   :  { %21 = dma.hbm_to_vmem [thread:$0]  %s618_s0, 128, %s19_s30, [#allocation3]  }
  0x24   :  { %s468_s18 = scalar_lea.hbm %s620_s2, 2048 }
  0x25   :  { %p469_p2 = scmp.ne.s32.totalorder %s620_s2, %s468_s18  ;;  %p472_p3 = scmp.lt.u32.totalorder %s468_s18, %s620_s2 }
  0x27   :  { %p474_p4 = pnand %p472_p3, %p469_p2 }
  0x29   :  { %477 = shalt.err (!%p474_p4)
}
  0x2a   :  { %s478_s23 = scalar_lea.vmem %s40_s6, 2048  ;;  %p483_p6 = scmp.lt.s32.totalorder %s40_s6, %s40_s6 }
  0x2b   :  { %p479_p5 = scmp.ne.s32.totalorder %s40_s6, %s478_s23  ;;  %p484_p7 = scmp.lt.s32.totalorder %s478_s23, %s478_s23 }
  0x2d   :  { %p485_p8 = por %p484_p7, %p483_p6 }
  0x2f   :  { %p486_p9 = pnand %p485_p8, %p479_p5 }
  0x31   :  { %489 = shalt.err (!%p486_p9)
}
  0x32   :  { %45 = dma.hbm_to_vmem [thread:$0]  %s620_s2, 2048, %s40_s6, [#allocation6], %s519_s25, %s519_s25, %s520_s26  }
  0x33   :  { %512 = dma.done.wait [#allocation3], 128  }
  0x34   :  { %513 = vsyncadd [#allocation3], 4294967168 }
  0x35   :  { %514 = dma.done.wait [#allocation6], 2560  }
  0x36   :  { %515 = vsyncadd [#allocation6], 4294964736  ;;  %v523_v0 = vmov 0.0|0.0   ;;  %vm524_vm0 = vmmov 0   ;;  %v525_v1 = vmov 0.0   ;;  %v62_v2 = vld [vmem:[#allocation5] sm:$0xff]  ;;  %v163_v54 = vlaneseq }
  0x37   :  { %381 = vmatprep.subr.bf16.mxu0 %v523_v0  ;;  %343 = vmatprep.mubr.msk.f32.mxu0 %vm524_vm0, %v525_v1  ;;  %v63_v3 = vld [vmem:[#allocation5 + $0x8] sm:$0xff]  ;;  %v64_v4 = vld [vmem:[#allocation5 + $0x10] sm:$0xff]  ;;  %v65_v6 = vld [vmem:[#allocation5 + $0x18] sm:$0xff]  ;;  %vm66_vm1 = vcmask 261120   ;;  %s526_s6 = smov [#allocation8]  }
  0x38   :  { %387 = vmatprep.subr.bf16.mxu1 %v523_v0  ;;  %378 = vmatprep.mubr.msk.f32.mxu1 %vm524_vm0, %v525_v1  ;;  %v382_v5 = vpack.c.bf16 %v63_v3, %v62_v2  ;;  %v385_v7 = vpack.c.bf16 %v65_v6, %v64_v4  ;;  %v57_v8 = vld [vmem:[#allocation2] sm:$0xff]  ;;  %v174_v9 = vld [vmem:[#allocation7] sm:$0xff]  ;;  %v175_v10 = vld [vmem:[#allocation7 + $0x8] sm:$0xff]  ;;  %v164_v55 = vshrl.u32 %v163_v54, 7  ;;  %s302_s7 = sshll.u32 %s526_s6, 4  ;;  %s303_s7 = int_to_ptr.vmem [resolvable:$true] %s302_s7 }
  0x39   :  { %v388_v11 = vpack.c.bf16 %v175_v10, %v174_v9  ;;  %v176_v12 = vld [vmem:[#allocation7 + $0x10] sm:$0xff]  ;;  %v177_v13 = vld [vmem:[#allocation7 + $0x18] sm:$0xff]  ;;  %v178_v15 = vld [vmem:[#allocation7 + $0x20] sm:$0xff]  ;;  %s490_s8 = scalar_lea.vmem %s303_s7, 128  ;;  %p495_p11 = scmp.lt.s32.totalorder %s303_s7, %s303_s7 }
  0x3a   :  { %383 = vmatpush3.bf16.msra.mxu0 %v382_v5  ;;  %v391_v14 = vpack.c.bf16 %v177_v13, %v176_v12  ;;  %v179_v16 = vld [vmem:[#allocation7 + $0x28] sm:$0xff]  ;;  %v180_v18 = vld [vmem:[#allocation7 + $0x30] sm:$0xff]  ;;  %v181_v19 = vld [vmem:[#allocation7 + $0x38] sm:$0xff]  ;;  %v165_v57 = vsub.s32 0, %v164_v55  ;;  %p491_p10 = scmp.ne.s32.totalorder %s303_s7, %s490_s8  ;;  %p496_p12 = scmp.lt.s32.totalorder %s490_s8, %s490_s8 }
  0x3b   :  { %384 = vmatprep.subr.bf16.mxu0 %v523_v0  ;;  %389 = vmatpush3.bf16.msra.mxu1 %v388_v11  ;;  %v394_v17 = vpack.c.bf16 %v179_v16, %v178_v15  ;;  %v397_v20 = vpack.c.bf16 %v181_v19, %v180_v18  ;;  %v182_v21 = vld [vmem:[#allocation7 + $0x40] sm:$0xff]  ;;  %v183_v22 = vld [vmem:[#allocation7 + $0x48] sm:$0xff]  ;;  %v184_v24 = vld [vmem:[#allocation7 + $0x50] sm:$0xff] }
  0x3c   :  { %390 = vmatprep.subr.bf16.mxu1 %v523_v0  ;;  %v400_v23 = vpack.c.bf16 %v183_v22, %v182_v21  ;;  %v185_v25 = vld [vmem:[#allocation7 + $0x58] sm:$0xff]  ;;  %v186_v27 = vld [vmem:[#allocation7 + $0x60] sm:$0xff]  ;;  %v187_v28 = vld [vmem:[#allocation7 + $0x68] sm:$0xff]  ;;  %p497_p13 = por %p496_p12, %p495_p11 }
  0x3d   :  { %v403_v26 = vpack.c.bf16 %v185_v25, %v184_v24  ;;  %v406_v29 = vpack.c.bf16 %v187_v28, %v186_v27  ;;  %v188_v30 = vld [vmem:[#allocation7 + $0x70] sm:$0xff]  ;;  %v189_v31 = vld [vmem:[#allocation7 + $0x78] sm:$0xff] }
  0x3e   :  { %386 = vmatpush3.bf16.msra.mxu0 %v385_v7  ;;  %v409_v32 = vpack.c.bf16 %v189_v31, %v188_v30  ;;  %v58_v56 = vld [vmem:[%s621_s3] sm:$0x1]  ;;  %v59_v60 = vld [vmem:[%s621_s3 + $0x1] sm:$0x1]  ;;  %v60_v25 = vld [vmem:[%s621_s3 + $0x2] sm:$0x1]  ;;  %p498_p0 = pnand %p497_p13, %p491_p10 }
  0x3f   :  { %392 = vmatpush3.bf16.msra.mxu1 %v391_v14  ;;  %v61_v28 = vld [vmem:[%s621_s3 + $0x3] sm:$0x1] }
  0x40   :  { %393 = vmatprep.subr.bf16.mxu1 %v523_v0 }
  0x41   :  { %344 = vmatmul.mubr.msk.f32.vlgmr.msra.gmra.mrb[0].mxu0 %vm66_vm1, %v57_v8 }
  0x43   :  { %395 = vmatpush3.bf16.msra.mxu1 %v394_v17 }
  0x44   :  { %396 = vmatprep.subr.bf16.mxu1 %v523_v0 }
  0x47   :  { %398 = vmatpush3.bf16.msra.mxu1 %v397_v20 }
  0x48   :  { %399 = vmatprep.subr.bf16.mxu1 %v523_v0 }
  0x4b   :  { %401 = vmatpush3.bf16.msra.mxu1 %v400_v23 }
  0x4c   :  { %402 = vmatprep.subr.bf16.mxu1 %v523_v0 }
  0x4f   :  { %404 = vmatpush3.bf16.msra.mxu1 %v403_v26 }
  0x50   :  { %405 = vmatprep.subr.bf16.mxu1 %v523_v0 }
  0x53   :  { %407 = vmatpush3.bf16.msra.mxu1 %v406_v29 }
  0x54   :  { %408 = vmatprep.subr.bf16.mxu1 %v523_v0 }
  0x57   :  { %410 = vmatpush3.bf16.msra.mxu1 %v409_v32 }
 0x114   :  { %v136_v33 = vpop.f32.mrb[0].mxu0 }
 0x115   :  { %v140_v34 = vrot.slane %v136_v33, 4  ;;  %v146_v35 = vmul.f32 %v136_v33, %v136_v33  ;;  %v345_v36 = vpop.f32.mrb[1].mxu0 }
 0x117   :  { %v141_v37 = vadd.f32 %v140_v34, %v136_v33  ;;  %v147_v38 = vrot.slane %v146_v35, 4 }
 0x119   :  { %v142_v39 = vrot.slane %v141_v37, 2  ;;  %v148_v40 = vadd.f32 %v147_v38, %v146_v35 }
 0x11b   :  { %v143_v41 = vadd.f32 %v142_v39, %v141_v37  ;;  %v149_v42 = vrot.slane %v148_v40, 2 }
 0x11d   :  { %v144_v43 = vrot.slane %v143_v41, 1  ;;  %v150_v44 = vadd.f32 %v149_v42, %v148_v40 }
 0x11f   :  { %v145_v45 = vadd.f32 %v144_v43, %v143_v41  ;;  %v151_v46 = vrot.slane %v150_v44, 1 }
 0x121   :  { %v152_v47 = vadd.f32 %v151_v46, %v150_v44  ;;  %v153_v48 = vmul.f32 0.125, %v145_v45 }
 0x123   :  { %v154_v49 = vmul.f32 0.125, %v152_v47  ;;  %v155_v50 = vmul.f32 %v153_v48, %v153_v48 }
 0x125   :  { %v156_v51 = vsub.f32 %v154_v49, %v155_v50 }
 0x127   :  { %v157_v52 = vmax.f32 %v156_v51, 0.0 }
 0x129   :  { %v158_v53 = vadd.f32 1e-05, %v157_v52 }
 0x12b   :  { %420 = vrsqrt.f32 %v158_v53 }
 0x135   :  { %v421_v58 = vpop.eup %420 }
 0x136   :  { %v160_v59 = vmul.f32 %v421_v58, %v58_v56 }
 0x138   :  { %v166_v61 = vrot.slane %v160_v59, %v165_v57  ;;  %v161_v62 = vmul.f32 %v160_v59, %v153_v48 }
 0x13a   :  { %v162_v63 = vsub.f32 %v59_v60, %v161_v62  ;;  %v167_v0 = vmul.f32 %v166_v61, %v136_v33 }
 0x13c   :  { %v171_v1 = vrot.slane %v162_v63, %v165_v57 }
 0x13e   :  { %v172_v2 = vadd.f32 %v171_v1, %v167_v0 }
 0x140   :  { %v173_v3 = vmax.f32 %v172_v2, 0.0 }
 0x142   :  { %379 = vmatmul.mubr.f32.vlgmr.msra.gmra.mrb[0].mxu1 %v173_v3 }
 0x215   :  { %v256_v4 = vpop.f32.mrb[0].mxu1 }
 0x216   :  { %v260_v5 = vrot.slane %v256_v4, 4  ;;  %v266_v6 = vmul.f32 %v256_v4, %v256_v4  ;;  %v380_v7 = vpop.f32.mrb[1].mxu1 }
 0x218   :  { %v261_v8 = vadd.f32 %v260_v5, %v256_v4  ;;  %v267_v9 = vrot.slane %v266_v6, 4 }
 0x21a   :  { %v262_v10 = vrot.slane %v261_v8, 2  ;;  %v268_v11 = vadd.f32 %v267_v9, %v266_v6 }
 0x21c   :  { %v263_v12 = vadd.f32 %v262_v10, %v261_v8  ;;  %v269_v13 = vrot.slane %v268_v11, 2 }
 0x21e   :  { %v264_v14 = vrot.slane %v263_v12, 1  ;;  %v270_v15 = vadd.f32 %v269_v13, %v268_v11 }
 0x220   :  { %v265_v16 = vadd.f32 %v264_v14, %v263_v12  ;;  %v271_v17 = vrot.slane %v270_v15, 1 }
 0x222   :  { %v272_v18 = vadd.f32 %v271_v17, %v270_v15  ;;  %v273_v19 = vmul.f32 0.125, %v265_v16 }
 0x224   :  { %v274_v20 = vmul.f32 0.125, %v272_v18  ;;  %v275_v21 = vmul.f32 %v273_v19, %v273_v19 }
 0x226   :  { %v276_v22 = vsub.f32 %v274_v20, %v275_v21 }
 0x228   :  { %v277_v23 = vmax.f32 %v276_v22, 0.0 }
 0x22a   :  { %v278_v24 = vadd.f32 1e-05, %v277_v23 }
 0x22c   :  { %422 = vrsqrt.f32 %v278_v24 }
 0x236   :  { %v423_v26 = vpop.eup %422 }
 0x237   :  { %v280_v27 = vmul.f32 %v423_v26, %v60_v25 }
 0x239   :  { %v281_v29 = vmul.f32 %v280_v27, %v273_v19  ;;  %v286_v30 = vrot.slane %v280_v27, %v165_v57 }
 0x23b   :  { %v282_v31 = vsub.f32 %v61_v28, %v281_v29  ;;  %v287_v32 = vmul.f32 %v286_v30, %v256_v4 }
 0x23d   :  { %v291_v33 = vrot.slane %v282_v31, %v165_v57 }
 0x23f   :  { %v292_v34 = vadd.f32 %v291_v33, %v287_v32 }
 0x241   :  { %v293_v35 = vmax.f32 %v292_v34, 0.0 }
 0x243   :  { %v294_v36 = vadd.f32 %v293_v35, %v173_v3 }
 0x245   :  { %295 = vst [vmem:[#allocation8] sm:$0xff] %v294_v36 }
 0x246   :  { %501 = shalt.err (!%p498_p0)
}
 0x247   :  { %s502_s10 = scalar_lea.hbm %s622_s4, 128 }
 0x248   :  { %p503_p1 = scmp.ne.s32.totalorder %s622_s4, %s502_s10  ;;  %p506_p2 = scmp.lt.u32.totalorder %s502_s10, %s622_s4 }
 0x24a   :  { %p508_p3 = pnand %p506_p2, %p503_p1 }
 0x24c   :  { %511 = shalt.err (!%p508_p3)
}
 0x24d   :  { %305 = dma.vmem_to_hbm [thread:$0]  %s303_s7, 128, %s622_s4, [#allocation4]  }
 0x24e   :  { %516 = dma.done.wait [#allocation4], 128  }
 0x24f   :  { %517 = vsyncadd [#allocation4], 4294967168 }
 0x250   :  { %309 = vsyncpa [#allocation3], 1 }
 0x251   :  { %310 = vsyncpa [#allocation6], 1 }
 0x252   :  { %311 = vsyncpa [#allocation4], 1 }

</bundles_post_ra>
